<compile_context>
chip_gen: v7x
topology: tpu7x:2x2x1
jax: 0.10.0
libtpu: 0.0.40
codegen_flags: <defaults>
</compile_context>

<pallas_src>
import functools
import math

import jax
import jax.numpy as jnp
from jax.experimental import pallas as pl
from jax.experimental.pallas import tpu as pltpu

_LANES = 128
_SUBLANES = 8


def _cdiv(a, b):
    return (a + b - 1) // b


def _round_up(a, b):
    return _cdiv(a, b) * b


def _mse_sum_kernel(p_ref, t_ref, o_ref, acc_ref, *, inv_n):
    i = pl.program_id(0)

    @pl.when(i == 0)
    def _init():
        acc_ref[...] = jnp.zeros_like(acc_ref)

    p = p_ref[...]
    t = t_ref[...]
    # Upcast only when inputs are narrower than f32 (e.g. bf16); no-op for f32.
    if p.dtype != jnp.float32:
        p = p.astype(jnp.float32)
    if t.dtype != jnp.float32:
        t = t.astype(jnp.float32)

    diff = p - t
    sq = diff * diff
    # Fold the (block_rows, 128) block into the (8, 128) accumulator with pure
    # VPU vreg adds (the reshape groups whole (8,128) tiles -> no copy, and no
    # cross-lane reduce inside the hot loop).
    acc_ref[...] += jnp.sum(sq.reshape(-1, _SUBLANES, _LANES), axis=0)

    @pl.when(i == pl.num_programs(0) - 1)
    def _finalize():
        # One cross-lane/sublane reduce + one divide by the true global N,
        # executed exactly once.
        o_ref[...] = jnp.sum(acc_ref[...], keepdims=True) * jnp.float32(inv_n)


def _to_lane_dense_slab(x, padded_rows):
    flat = x.reshape(-1)
    pad = padded_rows * _LANES - flat.shape[0]
    if pad:
        flat = jnp.pad(flat, (0, pad))  # zeros: (0-0)^2 contributes nothing
    return flat.reshape(padded_rows, _LANES)


def custom_mse_loss(predicted, target, *, block_rows=4096):
    """MSE loss = mean((predicted - target)**2), computed with a Pallas kernel."""
    assert predicted.shape == target.shape, (predicted.shape, target.shape)
    n_true = math.prod(predicted.shape)
    assert n_true > 0

    rows = _cdiv(n_true, _LANES)
    # Sublane dim of the block must be a multiple of 8; shrink for tiny inputs.
    block_rows = min(block_rows, _round_up(rows, _SUBLANES))
    padded_rows = _round_up(rows, block_rows)
    num_blocks = padded_rows // block_rows

    p2d = _to_lane_dense_slab(predicted, padded_rows)
    t2d = _to_lane_dense_slab(target, padded_rows)

    kernel = functools.partial(_mse_sum_kernel, inv_n=1.0 / float(n_true))

    out = pl.pallas_call(
        kernel,
        out_shape=jax.ShapeDtypeStruct((1, 1), jnp.float32),
        grid_spec=pltpu.PrefetchScalarGridSpec(
            num_scalar_prefetch=0,
            grid=(num_blocks,),
            in_specs=[
                pl.BlockSpec((block_rows, _LANES), lambda i: (i, 0)),
                pl.BlockSpec((block_rows, _LANES), lambda i: (i, 0)),
            ],
            out_specs=pl.BlockSpec((1, 1), lambda i: (0, 0)),
            scratch_shapes=[pltpu.VMEM((_SUBLANES, _LANES), jnp.float32)],
        ),
        compiler_params=pltpu.CompilerParams(
            dimension_semantics=("arbitrary",),  # reduction axis (accumulator)
        ),
    )(p2d, t2d)
    return out[0, 0]


if __name__ == "__main__":
    key = jax.random.PRNGKey(0)
    kp, kt, kp2, kt2, kp3, kt3 = jax.random.split(key, 6)

    # Shapes match the PyTorch example: predicted (5, 1), target (5, 1).
    predicted = jax.random.normal(kp, (5, 1), dtype=jnp.float32)
    target = jax.random.normal(kt, (5, 1), dtype=jnp.float32)

    loss = custom_mse_loss(predicted, target)
    jax.block_until_ready(loss)
    ref = jnp.mean((predicted - target) ** 2)
    assert jnp.allclose(loss, ref, rtol=1e-5, atol=1e-6), (loss, ref)

    # Secondary check: multi-block grid + non-multiple tail (zero-pad masking).
    p2 = jax.random.normal(kp2, (100, 30), dtype=jnp.float32)
    t2 = jax.random.normal(kt2, (100, 30), dtype=jnp.float32)
    loss2 = custom_mse_loss(p2, t2, block_rows=8)  # forces 3 grid steps
    jax.block_until_ready(loss2)
    ref2 = jnp.mean((p2 - t2) ** 2)
    assert jnp.allclose(loss2, ref2, rtol=1e-5, atol=1e-6), (loss2, ref2)

    # Third check: bf16 inputs exercise the in-register upcast path.
    p3 = jax.random.normal(kp3, (64, 64), dtype=jnp.bfloat16)
    t3 = jax.random.normal(kt3, (64, 64), dtype=jnp.bfloat16)
    loss3 = custom_mse_loss(p3, t3)
    jax.block_until_ready(loss3)
    ref3 = jnp.mean((p3.astype(jnp.float32) - t3.astype(jnp.float32)) ** 2)
    assert jnp.allclose(loss3, ref3, rtol=1e-2, atol=1e-3), (loss3, ref3)

    print("KERNEL_OK")
</pallas_src>

<mosaic_0001>
module attributes {stable_mosaic.version = 11 : i64} {
  func.func @_mse_sum_kernel(%arg0: i32, %arg1: memref<8x128xf32, #tpu.memory_space<vmem>>, %arg2: memref<8x128xf32, #tpu.memory_space<vmem>>, %arg3: memref<1x1xf32, #tpu.memory_space<vmem>>, %arg4: memref<8x128xf32, #tpu.memory_space<vmem>>) attributes {dimension_semantics = [#tpu.dimension_semantics<arbitrary>], iteration_bounds = array<i64: 1>, scalar_prefetch = 0 : i64, scratch_operands = 1 : i64, tpu.core_type = #tpu.core_type<tc>, window_params = [{transform_indices = @transform_0, window_bounds = array<i64: 8, 128>}, {transform_indices = @transform_1, window_bounds = array<i64: 8, 128>}, {pipeline_mode = #tpu.pipeline_mode<synchronous>, transform_indices = @transform_2, window_bounds = array<i64: 1, 1>}]} {
    %c0_i32 = arith.constant 0 : i32
    %0 = arith.cmpi eq, %arg0, %c0_i32 : i32
    %1 = arith.extui %0 : i1 to i32
    %c0_i32_0 = arith.constant 0 : i32
    %2 = arith.cmpi ne, %1, %c0_i32_0 : i32
    scf.if %2 {
      %cst_10 = arith.constant 0.000000e+00 : f32
      %15 = vector.broadcast %cst_10 : f32 to vector<8x128xf32>
      %c0_11 = arith.constant 0 : index
      %c0_12 = arith.constant 0 : index
      %16 = vector.load %arg4[%c0_11, %c0_12] : memref<8x128xf32, #tpu.memory_space<vmem>>, vector<8x128xf32>
      tpu.vector_store %arg4[%c0_11, %c0_12], %15 {strides = array<i32>} : memref<8x128xf32, #tpu.memory_space<vmem>>, vector<8x128xf32>,
    } else {
    }
    %c0 = arith.constant 0 : index
    %c0_1 = arith.constant 0 : index
    %3 = vector.load %arg1[%c0, %c0_1] : memref<8x128xf32, #tpu.memory_space<vmem>>, vector<8x128xf32>
    %c0_2 = arith.constant 0 : index
    %c0_3 = arith.constant 0 : index
    %4 = vector.load %arg2[%c0_2, %c0_3] : memref<8x128xf32, #tpu.memory_space<vmem>>, vector<8x128xf32>
    %5 = arith.subf %3, %4 : vector<8x128xf32>
    %6 = arith.mulf %5, %5 : vector<8x128xf32>
    %c0_4 = arith.constant 0 : index
    %c0_5 = arith.constant 0 : index
    %7 = vector.load %arg4[%c0_4, %c0_5] : memref<8x128xf32, #tpu.memory_space<vmem>>, vector<8x128xf32>
    %8 = vector.shape_cast %6 : vector<8x128xf32> to vector<1x8x128xf32>
    %cst = arith.constant dense<0.000000e+00> : vector<8x128xf32>
    %9 = vector.multi_reduction <add>, %8, %cst [0] : vector<1x8x128xf32> to vector<8x128xf32>
    %10 = arith.addf %7, %9 : vector<8x128xf32>
    %c0_6 = arith.constant 0 : index
    %c0_7 = arith.constant 0 : index
    %11 = vector.load %arg4[%c0_6, %c0_7] : memref<8x128xf32, #tpu.memory_space<vmem>>, vector<8x128xf32>
    tpu.vector_store %arg4[%c0_6, %c0_7], %10 {strides = array<i32>} : memref<8x128xf32, #tpu.memory_space<vmem>>, vector<8x128xf32>,
    %c0_i32_8 = arith.constant 0 : i32
    %12 = arith.cmpi eq, %arg0, %c0_i32_8 : i32
    %13 = arith.extui %12 : i1 to i32
    %c0_i32_9 = arith.constant 0 : i32
    %14 = arith.cmpi ne, %13, %c0_i32_9 : i32
    scf.if %14 {
      %c0_10 = arith.constant 0 : index
      %c0_11 = arith.constant 0 : index
      %15 = vector.load %arg4[%c0_10, %c0_11] : memref<8x128xf32, #tpu.memory_space<vmem>>, vector<8x128xf32>
      %16 = vector.shape_cast %15 : vector<8x128xf32> to vector<1x8x128xf32>
      %cst_12 = arith.constant dense<0.000000e+00> : vector<1xf32>
      %17 = vector.multi_reduction <add>, %16, %cst_12 [1, 2] : vector<1x8x128xf32> to vector<1xf32>
      %18 = vector.shape_cast %17 : vector<1xf32> to vector<1x1x1xf32>
      %19 = vector.extract %18[0, 0, 0] : f32 from vector<1x1x1xf32>
      %20 = vector.broadcast %19 : f32 to vector<1x1xf32>
      %cst_13 = arith.constant 2.000000e-01 : f32
      %21 = vector.broadcast %cst_13 : f32 to vector<1x1xf32>
      %22 = arith.mulf %20, %21 : vector<1x1xf32>
      %c0_14 = arith.constant 0 : index
      %c0_15 = arith.constant 0 : index
      %23 = vector.load %arg3[%c0_14, %c0_15] : memref<1x1xf32, #tpu.memory_space<vmem>>, vector<1x1xf32>
      tpu.vector_store %arg3[%c0_14, %c0_15], %22 {strides = array<i32>} : memref<1x1xf32, #tpu.memory_space<vmem>>, vector<1x1xf32>,
    } else {
    }
    return
  }
  func.func @transform_0(%arg0: i32) -> (i32, i32) {
    %c0_i32 = arith.constant 0 : i32
    %c0_i32_0 = arith.constant 0 : i32
    return %arg0, %c0_i32 : i32, i32
  }
  func.func @transform_1(%arg0: i32) -> (i32, i32) {
    %c0_i32 = arith.constant 0 : i32
    %c0_i32_0 = arith.constant 0 : i32
    return %arg0, %c0_i32 : i32, i32
  }
  func.func @transform_2(%arg0: i32) -> (i32, i32) {
    %c0_i32 = arith.constant 0 : i32
    %c0_i32_0 = arith.constant 0 : i32
    %c0_i32_1 = arith.constant 0 : i32
    return %c0_i32, %c0_i32_0 : i32, i32
  }
}

</mosaic_0001>

<bundles_post_ra>
// kernel: tpu_custom_call.1
= control target key start
LH: loop header
LB: loop body
LE: loop exit
PB: predicated region body
PF: predicated region fallthrough
CT: control target
= control target key end

     0   :  { %7 = vsyncpa [#allocation4], 0  ;;  %s213_s0 = inlined_call_operand.hbm [shape: f32[8,128], index: 0, kind: input, shape index: {}]   ;;  %s214_s1 = inlined_call_operand.hbm [shape: f32[8,128], index: 1, kind: input, shape index: {}]   ;;  %s215_s2 = inlined_call_operand.hbm [shape: f32[1,1], index: 2, kind: output, shape index: {}]  }
   0x1   :  { %8 = vsyncpa [#allocation7], 0 }
   0x2   :  { %9 = vsyncpa [#allocation5], 0  ;;  %s159_s9 = smov [#allocation3]   ;;  %s160_s11 = smov [#allocation6]  }
   0x3   :  { %s16_s10 = sshll.u32 %s159_s9, 4  ;;  %s26_s12 = sshll.u32 %s160_s11, 4  ;;  %s17_s10 = int_to_ptr.vmem [resolvable:$true] %s16_s10  ;;  %s27_s12 = int_to_ptr.vmem [resolvable:$true] %s26_s12 }
   0x4   :  { %s87_s15 = scalar_lea.hbm %s213_s0, 128 }
   0x5   :  { %p88_p0 = scmp.ne.s32.totalorder %s213_s0, %s87_s15  ;;  %p91_p1 = scmp.lt.u32.totalorder %s87_s15, %s213_s0 }
   0x7   :  { %p93_p2 = pnand %p91_p1, %p88_p0 }
   0x9   :  { %96 = shalt.err (!%p93_p2)
}
   0xa   :  { %s97_s20 = scalar_lea.vmem %s17_s10, 128  ;;  %p102_p4 = scmp.lt.s32.totalorder %s17_s10, %s17_s10 }
   0xb   :  { %p98_p3 = scmp.ne.s32.totalorder %s17_s10, %s97_s20  ;;  %p103_p5 = scmp.lt.s32.totalorder %s97_s20, %s97_s20 }
   0xd   :  { %p104_p6 = por %p103_p5, %p102_p4 }
   0xf   :  { %p105_p7 = pnand %p104_p6, %p98_p3 }
  0x11   :  { %108 = shalt.err (!%p105_p7)
}
  0x12   :  { %19 = dma.hbm_to_vmem [thread:$0]  %s213_s0, 128, %s17_s10, [#allocation4]  }
  0x13   :  { %s109_s25 = scalar_lea.hbm %s214_s1, 128 }
  0x14   :  { %p110_p8 = scmp.ne.s32.totalorder %s214_s1, %s109_s25  ;;  %p113_p9 = scmp.lt.u32.totalorder %s109_s25, %s214_s1 }
  0x16   :  { %p115_p10 = pnand %p113_p9, %p110_p8 }
  0x18   :  { %118 = shalt.err (!%p115_p10)
}
  0x19   :  { %s119_s30 = scalar_lea.vmem %s27_s12, 128  ;;  %p124_p12 = scmp.lt.s32.totalorder %s27_s12, %s27_s12 }
  0x1a   :  { %p120_p11 = scmp.ne.s32.totalorder %s27_s12, %s119_s30  ;;  %p125_p13 = scmp.lt.s32.totalorder %s119_s30, %s119_s30 }
  0x1c   :  { %p126_p0 = por %p125_p13, %p124_p12 }
  0x1e   :  { %p127_p1 = pnand %p126_p0, %p120_p11 }
  0x20   :  { %130 = shalt.err (!%p127_p1)
}
  0x21   :  { %29 = dma.hbm_to_vmem [thread:$0]  %s214_s1, 128, %s27_s12, [#allocation7]  }
  0x22   :  { %153 = dma.done.wait [#allocation4], 128  }
  0x23   :  { %154 = vsyncadd [#allocation4], 4294967168 }
  0x24   :  { %155 = dma.done.wait [#allocation7], 128  }
  0x25   :  { %156 = vsyncadd [#allocation7], 4294967168  ;;  %v41_v0 = vld [vmem:[#allocation3] sm:$0xff]  ;;  %v42_v1 = vld [vmem:[#allocation6] sm:$0xff]  ;;  %s161_s4 = smov [#allocation8]   ;;  %vm64_vm0 = vcmask 0  }
  0x26   :  { %v43_v2 = vsub.f32 %v41_v0, %v42_v1  ;;  %s72_s5 = sshll.u32 %s161_s4, 4  ;;  %s73_s5 = int_to_ptr.vmem [resolvable:$true] %s72_s5 }
  0x27   :  { %s131_s6 = scalar_lea.vmem %s73_s5, 16  ;;  %s135_s7 = scalar_lea.vmem %s73_s5, 32 }
  0x28   :  { %v44_v3 = vmul.f32 %v43_v2, %v43_v2  ;;  %p132_p2 = scmp.ne.s32.totalorder %s73_s5, %s131_s6  ;;  %p136_p3 = scmp.lt.s32.totalorder %s73_s5, %s73_s5 }
  0x29   :  { %p137_p4 = scmp.lt.s32.totalorder %s135_s7, %s131_s6 }
  0x2a   :  { %53 = vadd.xlane.f32.xlu0 %v44_v3 }
  0x2b   :  { %p138_p5 = por %p137_p4, %p136_p3 }
  0x2d   :  { %p139_p6 = pnand %p138_p5, %p132_p2 }
  0xb7   :  { %v54_v4 = vpop.xlane.xlu0 %53 }
  0xb8   :  { %v55_v5 = vrot.slane %v54_v4, 4 }
  0xba   :  { %v56_v6 = vadd.f32 %v55_v5, %v54_v4 }
  0xbc   :  { %v57_v7 = vrot.slane %v56_v6, 2 }
  0xbe   :  { %v58_v8 = vadd.f32 %v57_v7, %v56_v6 }
  0xc0   :  { %v59_v9 = vrot.slane %v58_v8, 1 }
  0xc2   :  { %v60_v10 = vadd.f32 %v59_v9, %v58_v8 }
  0xc4   :  { %82 = vpush %v60_v10 }
  0xf5   :  { %s83_s1 = spop %82 }
  0xf6   :  { %v62_v11 = vstv %s83_s1 }
  0xf7   :  { %v63_v12 = vmul.f32 0.2, %v62_v11 }
  0xf9   :  { %65 = vst.msk [vmem:[#allocation8] sm:$0x1] %vm64_vm0, %v63_v12 }
  0xfa   :  { %142 = shalt.err (!%p139_p6)
}
  0xfb   :  { %s143_s10 = scalar_lea.hbm %s215_s2, 16 }
  0xfc   :  { %p144_p7 = scmp.ne.s32.totalorder %s215_s2, %s143_s10  ;;  %p147_p8 = scmp.lt.u32.totalorder %s143_s10, %s215_s2 }
  0xfe   :  { %p149_p9 = pnand %p147_p8, %p144_p7 }
 0x100   :  { %152 = shalt.err (!%p149_p9)
}
 0x101   :  { %75 = dma.vmem_to_hbm [thread:$0]  %s73_s5, 16, %s215_s2, [#allocation5]  }
 0x102   :  { %157 = dma.done.wait [#allocation5], 16  }
 0x103   :  { %158 = vsyncadd [#allocation5], 4294967280 }
 0x104   :  { %79 = vsyncpa [#allocation4], 1 }
 0x105   :  { %80 = vsyncpa [#allocation7], 1 }
 0x106   :  { %81 = vsyncpa [#allocation5], 1 }

</bundles_post_ra>
